<compile_context>
chip_gen: v6e
topology: v6e:2x2x1
jax: 0.10.0
libtpu: 0.0.40
codegen_flags: <defaults>
</compile_context>

<pallas_src>
import functools

import jax
import jax.numpy as jnp
from jax.experimental import pallas as pl
from jax.experimental.pallas import tpu as pltpu


def _round_up(n, m):
    return ((n + m - 1) // m) * m


def _grid_steps_for_device():
    """1 step on single-TC chips (v5e/v6e); 2 on dual-TC chips (v7x/v5p/v4)."""
    try:
        kind = jax.devices()[0].device_kind.lower()
    except Exception:
        return 1
    if ("v7" in kind) or ("v5p" in kind) or ("v4" in kind):
        return 2
    return 1


def mlp_kernel(x_ref, p1_ref, p2_ref, p3_ref, o_ref, *, in_dim, hid_dim):
    """One batch tile of the fused MLP.  p*_ref = [W; b] (bias in last row)."""
    f32 = jnp.float32
    x = x_ref[...]

    w1 = p1_ref[0:in_dim, :]
    b1 = p1_ref[in_dim:in_dim + 1, :].astype(f32)
    w2 = p2_ref[0:hid_dim, :]
    b2 = p2_ref[hid_dim:hid_dim + 1, :].astype(f32)
    w3 = p3_ref[0:hid_dim, :]
    b3 = p3_ref[hid_dim:hid_dim + 1, :].astype(f32)

    # MXU matmuls with f32 accumulation; bias-add / ReLU stay in f32.
    # (astype is a no-op when x / activations already match the param dtype.)
    h1 = jnp.maximum(
        jnp.dot(x.astype(w1.dtype), w1, preferred_element_type=f32) + b1, 0.0)
    h2 = jnp.maximum(
        jnp.dot(h1.astype(w2.dtype), w2, preferred_element_type=f32) + b2, 0.0)
    out = jnp.dot(h2.astype(w3.dtype), w3, preferred_element_type=f32) + b3
    o_ref[...] = out.astype(o_ref.dtype)


def pack_params(w1, b1, w2, b2, w3, b3):
    """One-time packing: each layer -> [W; b] so the kernel needs 4 input DMAs.
    Call once, outside the per-step hot path."""
    p1 = jnp.concatenate([w1, b1.reshape(1, -1)], axis=0)
    p2 = jnp.concatenate([w2, b2.reshape(1, -1)], axis=0)
    p3 = jnp.concatenate([w3, b3.reshape(1, -1)], axis=0)
    return p1, p2, p3


def mlp_forward(x, p1, p2, p3, *, max_block_rows=2048):
    batch, in_dim = x.shape
    hid = p1.shape[1]
    action_dim = p3.shape[1]

    # Adaptive batch tiling: 1 step (v5e/v6e) or 2 steps (dual-TC chips),
    # block_rows a multiple of 8 sublanes, capped for very large batches.
    steps = _grid_steps_for_device()
    padded_batch = _round_up(batch, 8)
    block_rows = _round_up(-(-padded_batch // steps), 8)
    block_rows = min(block_rows, _round_up(max_block_rows, 8))
    padded_batch = _round_up(padded_batch, block_rows)
    if padded_batch != batch:
        x = jnp.pad(x, ((0, padded_batch - batch), (0, 0)))
    grid = (padded_batch // block_rows,)

    flops = 2 * padded_batch * (in_dim * hid + hid * hid + hid * action_dim)
    bytes_accessed = (x.size * x.dtype.itemsize
                      + p1.size * p1.dtype.itemsize
                      + p2.size * p2.dtype.itemsize
                      + p3.size * p3.dtype.itemsize
                      + padded_batch * action_dim * 4)

    kernel = functools.partial(mlp_kernel, in_dim=in_dim, hid_dim=hid)

    out = pl.pallas_call(
        kernel,
        out_shape=jax.ShapeDtypeStruct((padded_batch, action_dim), jnp.float32),
        grid=grid,
        in_specs=[
            pl.BlockSpec((block_rows, in_dim), lambda i: (i, 0)),
            # Constant block index -> weights DMA'd once, resident in VMEM.
            pl.BlockSpec(p1.shape, lambda i: (0, 0)),
            pl.BlockSpec(p2.shape, lambda i: (0, 0)),
            pl.BlockSpec(p3.shape, lambda i: (0, 0)),
        ],
        # Unpadded output block: last dim equals the full array dim, so no
        # 128-lane padding and no inflated HBM writeback.
        out_specs=pl.BlockSpec((block_rows, action_dim), lambda i: (i, 0)),
        compiler_params=pltpu.CompilerParams(
            dimension_semantics=("parallel",)),  # megacore split on dual-TC chips
        cost_estimate=pl.CostEstimate(
            flops=flops, transcendentals=0, bytes_accessed=bytes_accessed),
    )(x, p1, p2, p3)

    return out[:batch]


def init_linear(key, in_dim, out_dim):
    # Deterministic init mimicking nn.Linear's uniform(-1/sqrt(in), 1/sqrt(in)).
    kw, kb = jax.random.split(key)
    bound = 1.0 / jnp.sqrt(jnp.float32(in_dim))
    w = jax.random.uniform(kw, (in_dim, out_dim), jnp.float32, -bound, bound)
    b = jax.random.uniform(kb, (out_dim,), jnp.float32, -bound, bound)
    return w, b


def reference_forward(x, w1, b1, w2, b2, w3, b3):
    h1 = jnp.maximum(x @ w1 + b1, 0.0)
    h2 = jnp.maximum(h1 @ w2 + b2, 0.0)
    return h2 @ w3 + b3


if __name__ == "__main__":
    belief_dim = 32
    obs_dim = 16          # unused by the module's forward (as in the PyTorch spec)
    actor_hidden_dim = 32
    action_dim = 8
    batch = 100           # exercises row padding (100 -> 104 rows)

    key = jax.random.PRNGKey(0)
    kx, k1, k2, k3 = jax.random.split(key, 4)

    x = jax.random.normal(kx, (batch, belief_dim), jnp.float32)
    w1, b1 = init_linear(k1, belief_dim, actor_hidden_dim)
    w2, b2 = init_linear(k2, actor_hidden_dim, actor_hidden_dim)
    w3, b3 = init_linear(k3, actor_hidden_dim, action_dim)

    # One-time parameter packing, hoisted out of the hot path.
    p1, p2, p3 = pack_params(w1, b1, w2, b2, w3, b3)

    fwd = jax.jit(mlp_forward)
    out = jax.block_until_ready(fwd(x, p1, p2, p3))
    ref = reference_forward(x, w1, b1, w2, b2, w3, b3)

    assert out.shape == (batch, action_dim)
    assert jnp.allclose(out, ref, atol=1e-4, rtol=1e-4), float(
        jnp.max(jnp.abs(out - ref)))

    print("KERNEL_OK")
</pallas_src>

<mosaic_0001>
module attributes {stable_mosaic.version = 11 : i64} {
  func.func @mlp_kernel(%arg0: i32, %arg1: memref<104x32xf32, #tpu.memory_space<vmem>>, %arg2: memref<33x32xf32, #tpu.memory_space<vmem>>, %arg3: memref<33x32xf32, #tpu.memory_space<vmem>>, %arg4: memref<33x8xf32, #tpu.memory_space<vmem>>, %arg5: memref<104x8xf32, #tpu.memory_space<vmem>>) attributes {dimension_semantics = [#tpu.dimension_semantics<parallel>], iteration_bounds = array<i64: 1>, scalar_prefetch = 0 : i64, scratch_operands = 0 : i64, tpu.core_type = #tpu.core_type<tc>, window_params = [{transform_indices = @transform_0, window_bounds = array<i64: 104, 32>}, {pipeline_mode = #tpu.pipeline_mode<synchronous>, transform_indices = @transform_1, window_bounds = array<i64: 33, 32>}, {pipeline_mode = #tpu.pipeline_mode<synchronous>, transform_indices = @transform_2, window_bounds = array<i64: 33, 32>}, {pipeline_mode = #tpu.pipeline_mode<synchronous>, transform_indices = @transform_3, window_bounds = array<i64: 33, 8>}, {transform_indices = @transform_4, window_bounds = array<i64: 104, 8>}]} {
    %c0 = arith.constant 0 : index
    %c0_0 = arith.constant 0 : index
    %0 = vector.load %arg1[%c0, %c0_0] : memref<104x32xf32, #tpu.memory_space<vmem>>, vector<104x32xf32>
    %c0_1 = arith.constant 0 : index
    %c0_2 = arith.constant 0 : index
    %1 = vector.load %arg2[%c0_1, %c0_2] : memref<33x32xf32, #tpu.memory_space<vmem>>, vector<32x32xf32>
    %c32 = arith.constant 32 : index
    %c0_3 = arith.constant 0 : index
    %2 = vector.load %arg2[%c32, %c0_3] : memref<33x32xf32, #tpu.memory_space<vmem>>, vector<1x32xf32>
    %c0_4 = arith.constant 0 : index
    %c0_5 = arith.constant 0 : index
    %3 = vector.load %arg3[%c0_4, %c0_5] : memref<33x32xf32, #tpu.memory_space<vmem>>, vector<32x32xf32>
    %c32_6 = arith.constant 32 : index
    %c0_7 = arith.constant 0 : index
    %4 = vector.load %arg3[%c32_6, %c0_7] : memref<33x32xf32, #tpu.memory_space<vmem>>, vector<1x32xf32>
    %c0_8 = arith.constant 0 : index
    %c0_9 = arith.constant 0 : index
    %5 = vector.load %arg4[%c0_8, %c0_9] : memref<33x8xf32, #tpu.memory_space<vmem>>, vector<32x8xf32>
    %c32_10 = arith.constant 32 : index
    %c0_11 = arith.constant 0 : index
    %6 = vector.load %arg4[%c32_10, %c0_11] : memref<33x8xf32, #tpu.memory_space<vmem>>, vector<1x8xf32>
    %cst = arith.constant dense<0.000000e+00> : vector<104x32xf32>
    %7 = tpu.matmul %0, %1, %cst {dimension_numbers = #tpu.dot_dimension_numbers<[1], [0], [0], [1], [0, 0, 1, 1], [], []>} : vector<104x32xf32>, vector<32x32xf32>, vector<104x32xf32> -> vector<104x32xf32>
    %8 = vector.broadcast %2 : vector<1x32xf32> to vector<104x32xf32>
    %9 = arith.addf %7, %8 : vector<104x32xf32>
    %cst_12 = arith.constant 0.000000e+00 : f32
    %10 = vector.broadcast %cst_12 : f32 to vector<104x32xf32>
    %11 = arith.maximumf %9, %10 : vector<104x32xf32>
    %cst_13 = arith.constant dense<0.000000e+00> : vector<104x32xf32>
    %12 = tpu.matmul %11, %3, %cst_13 {dimension_numbers = #tpu.dot_dimension_numbers<[1], [0], [0], [1], [0, 0, 1, 1], [], []>} : vector<104x32xf32>, vector<32x32xf32>, vector<104x32xf32> -> vector<104x32xf32>
    %13 = vector.broadcast %4 : vector<1x32xf32> to vector<104x32xf32>
    %14 = arith.addf %12, %13 : vector<104x32xf32>
    %cst_14 = arith.constant 0.000000e+00 : f32
    %15 = vector.broadcast %cst_14 : f32 to vector<104x32xf32>
    %16 = arith.maximumf %14, %15 : vector<104x32xf32>
    %cst_15 = arith.constant dense<0.000000e+00> : vector<104x8xf32>
    %17 = tpu.matmul %16, %5, %cst_15 {dimension_numbers = #tpu.dot_dimension_numbers<[1], [0], [0], [1], [0, 0, 1, 1], [], []>} : vector<104x32xf32>, vector<32x8xf32>, vector<104x8xf32> -> vector<104x8xf32>
    %18 = vector.broadcast %6 : vector<1x8xf32> to vector<104x8xf32>
    %19 = arith.addf %17, %18 : vector<104x8xf32>
    %c0_16 = arith.constant 0 : index
    %c0_17 = arith.constant 0 : index
    %20 = vector.load %arg5[%c0_16, %c0_17] : memref<104x8xf32, #tpu.memory_space<vmem>>, vector<104x8xf32>
    tpu.vector_store %arg5[%c0_16, %c0_17], %19 {strides = array<i32>} : memref<104x8xf32, #tpu.memory_space<vmem>>, vector<104x8xf32>,
    return
  }
  func.func @transform_0(%arg0: i32) -> (i32, i32) {
    %c0_i32 = arith.constant 0 : i32
    %c0_i32_0 = arith.constant 0 : i32
    return %arg0, %c0_i32 : i32, i32
  }
  func.func @transform_1(%arg0: i32) -> (i32, i32) {
    %c0_i32 = arith.constant 0 : i32
    %c0_i32_0 = arith.constant 0 : i32
    %c0_i32_1 = arith.constant 0 : i32
    return %c0_i32, %c0_i32_0 : i32, i32
  }
  func.func @transform_2(%arg0: i32) -> (i32, i32) {
    %c0_i32 = arith.constant 0 : i32
    %c0_i32_0 = arith.constant 0 : i32
    %c0_i32_1 = arith.constant 0 : i32
    return %c0_i32, %c0_i32_0 : i32, i32
  }
  func.func @transform_3(%arg0: i32) -> (i32, i32) {
    %c0_i32 = arith.constant 0 : i32
    %c0_i32_0 = arith.constant 0 : i32
    %c0_i32_1 = arith.constant 0 : i32
    return %c0_i32, %c0_i32_0 : i32, i32
  }
  func.func @transform_4(%arg0: i32) -> (i32, i32) {
    %c0_i32 = arith.constant 0 : i32
    %c0_i32_0 = arith.constant 0 : i32
    return %arg0, %c0_i32 : i32, i32
  }
}

</mosaic_0001>

<bundles_post_ra>
// kernel: mlp_forward.1
= control target key start
LH: loop header
LB: loop body
LE: loop exit
PB: predicated region body
PF: predicated region fallthrough
CT: control target
= control target key end

     0   :  { %v853_v0 = vmov 0.0   ;;  %vm854_vm0 = vmmov 0   ;;  %vm49_vm1 = vcmask 261120   ;;  %vm591_vm2 = vcmask 64512   ;;  %s1179_s1 = inlined_call_operand.vmem [shape: f32[33,32], index: 1, kind: input, shape index: {}]   ;;  %s1180_s0 = inlined_call_operand.vmem [shape: f32[104,32], index: 0, kind: input, shape index: {}]   ;;  %s1181_s2 = inlined_call_operand.vmem [shape: f32[33,32], index: 2, kind: input, shape index: {}]   ;;  %s1182_s3 = inlined_call_operand.vmem [shape: f32[33,8], index: 3, kind: input, shape index: {}]   ;;  %s1183_s4 = inlined_call_operand.vmem [shape: f32[104,8], index: 4, kind: output, shape index: {}]  }
   0x1   :  { %702 = vmatprep.subr.mxu0 %v853_v0  ;;  %v33_v1 = vld [vmem:[%s1179_s1 + $0x18] sm:$0xff]  ;;  %v32_v2 = vld [vmem:[%s1179_s1 + $0x10] sm:$0xff]  ;;  %710 = vmatprep.mubr.msk.f32.mxu0 %vm854_vm0, %v853_v0  ;;  %v31_v3 = vld [vmem:[%s1179_s1 + $0x8] sm:$0xff] }
   0x2   :  { %703 = vmatpush3.msra.mxu0 %v33_v1  ;;  %843 = vmatprep.subr.mxu1 %v853_v0  ;;  %v30_v4 = vld [vmem:[%s1179_s1] sm:$0xff]  ;;  %v24_v6 = vld [vmem:[%s1180_s0 + $0x38] sm:$0xff]  ;;  %v18_v8 = vld [vmem:[%s1180_s0 + $0x8] sm:$0xff] }
   0x3   :  { %704 = vmatprep.subr.mxu0 %v853_v0  ;;  %847 = vmatpush3.msra.mxu1 %v33_v1  ;;  %v17_v5 = vld [vmem:[%s1180_s0] sm:$0xff]  ;;  %v38_v7 = vld [vmem:[%s1181_s2 + $0x18] sm:$0xff]  ;;  %v37_v9 = vld [vmem:[%s1181_s2 + $0x10] sm:$0xff] }
   0x4   :  { %705 = vmatpush3.msra.mxu0 %v32_v2  ;;  %844 = vmatprep.subr.mxu1 %v853_v0  ;;  %v25_v10 = vld [vmem:[%s1180_s0 + $0x40] sm:$0xff]  ;;  %v36_v11 = vld [vmem:[%s1181_s2 + $0x8] sm:$0xff]  ;;  %v19_v12 = vld [vmem:[%s1180_s0 + $0x10] sm:$0xff] }
   0x5   :  { %706 = vmatprep.subr.mxu0 %v853_v0  ;;  %848 = vmatpush3.msra.mxu1 %v32_v2  ;;  %v35_v13 = vld [vmem:[%s1181_s2] sm:$0xff]  ;;  %v26_v14 = vld [vmem:[%s1180_s0 + $0x48] sm:$0xff]  ;;  %v20_v15 = vld [vmem:[%s1180_s0 + $0x18] sm:$0xff] }
   0x6   :  { %707 = vmatpush3.msra.mxu0 %v31_v3  ;;  %845 = vmatprep.subr.mxu1 %v853_v0  ;;  %v27_v16 = vld [vmem:[%s1180_s0 + $0x50] sm:$0xff]  ;;  %v21_v17 = vld [vmem:[%s1180_s0 + $0x20] sm:$0xff]  ;;  %v28_v18 = vld [vmem:[%s1180_s0 + $0x58] sm:$0xff] }
   0x7   :  { %708 = vmatprep.subr.mxu0 %v853_v0  ;;  %849 = vmatpush3.msra.mxu1 %v31_v3  ;;  %v22_v19 = vld [vmem:[%s1180_s0 + $0x28] sm:$0xff]  ;;  %v29_v20 = vld [vmem:[%s1180_s0 + $0x60] sm:$0xff]  ;;  %v23_v21 = vld [vmem:[%s1180_s0 + $0x30] sm:$0xff] }
   0x8   :  { %709 = vmatpush3.msra.mxu0 %v30_v4  ;;  %846 = vmatprep.subr.mxu1 %v853_v0  ;;  %v43_v22 = vld [vmem:[%s1182_s3 + $0x18] sm:$0xff]  ;;  %v42_v23 = vld [vmem:[%s1182_s3 + $0x10] sm:$0xff]  ;;  %v41_v24 = vld [vmem:[%s1182_s3 + $0x8] sm:$0xff] }
   0x9   :  { %711 = vmatmul.mubr.msk.f32.vlgmr.msra.gmra.mxu0 %vm49_vm1, %v17_v5  ;;  %850 = vmatpush3.msra.mxu1 %v30_v4  ;;  %v40_v25 = vld [vmem:[%s1182_s3] sm:$0xff] }
   0xa   :  { %713 = vmatprep.mubr.msk.f32.mxu0 %vm854_vm0, %v853_v0  ;;  %731 = vmatprep.mubr.msk.f32.mxu1 %vm854_vm0, %v853_v0  ;;  %v1017_v26 = vld [vmem:[%s1179_s1 + $0x20] ss:$0 sm:$0xff] }
   0xb   :  { %732 = vmatmul.mubr.msk.f32.vlgmr.msra.gmra.mxu1 %vm49_vm1, %v24_v6  ;;  %749 = vmatprep.subr.mxu1 %v853_v0 }
   0xc   :  { %734 = vmatprep.mubr.msk.f32.mxu1 %vm854_vm0, %v853_v0  ;;  %750 = vmatpush3.msra.mxu1 %v38_v7 }
   0xd   :  { %714 = vmatmul.mubr.msk.f32.gmra.mxu0 %vm49_vm1, %v18_v8  ;;  %751 = vmatprep.subr.mxu1 %v853_v0 }
   0xe   :  { %716 = vmatprep.mubr.msk.f32.mxu0 %vm854_vm0, %v853_v0  ;;  %752 = vmatpush3.msra.mxu1 %v37_v9 }
   0xf   :  { %735 = vmatmul.mubr.msk.f32.gmra.mxu1 %vm49_vm1, %v25_v10  ;;  %753 = vmatprep.subr.mxu1 %v853_v0 }
  0x10   :  { %737 = vmatprep.mubr.msk.f32.mxu1 %vm854_vm0, %v853_v0  ;;  %754 = vmatpush3.msra.mxu1 %v36_v11 }
  0x11   :  { %717 = vmatmul.mubr.msk.f32.gmra.mxu0 %vm49_vm1, %v19_v12  ;;  %755 = vmatprep.subr.mxu1 %v853_v0 }
  0x12   :  { %719 = vmatprep.mubr.msk.f32.mxu0 %vm854_vm0, %v853_v0  ;;  %756 = vmatpush3.msra.mxu1 %v35_v13 }
  0x13   :  { %738 = vmatmul.mubr.msk.f32.gmra.mxu1 %vm49_vm1, %v26_v14  ;;  %796 = vmatprep.subr.mxu0 %v853_v0 }
  0x14   :  { %740 = vmatprep.mubr.msk.f32.mxu1 %vm854_vm0, %v853_v0  ;;  %797 = vmatpush3.msra.mxu0 %v43_v22 }
  0x15   :  { %720 = vmatmul.mubr.msk.f32.gmra.mxu0 %vm49_vm1, %v20_v15  ;;  %798 = vmatprep.subr.mxu0 %v853_v0 }
  0x16   :  { %722 = vmatprep.mubr.msk.f32.mxu0 %vm854_vm0, %v853_v0  ;;  %799 = vmatpush3.msra.mxu0 %v42_v23 }
  0x17   :  { %741 = vmatmul.mubr.msk.f32.gmra.mxu1 %vm49_vm1, %v27_v16  ;;  %800 = vmatprep.subr.mxu0 %v853_v0  ;;  %v1072_v16 = vld [vmem:[%s1181_s2 + $0x20] ss:$0 sm:$0xff] }
  0x18   :  { %743 = vmatprep.mubr.msk.f32.mxu1 %vm854_vm0, %v853_v0  ;;  %801 = vmatpush3.msra.mxu0 %v41_v24 }
  0x19   :  { %723 = vmatmul.mubr.msk.f32.gmra.mxu0 %vm49_vm1, %v21_v17  ;;  %802 = vmatprep.subr.mxu0 %v853_v0 }
  0x1a   :  { %725 = vmatprep.mubr.msk.f32.mxu0 %vm854_vm0, %v853_v0  ;;  %803 = vmatpush3.msra.mxu0 %v40_v25 }
  0x1b   :  { %744 = vmatmul.mubr.msk.f32.gmra.mxu1 %vm49_vm1, %v28_v18 }
  0x1c   :  { %746 = vmatprep.mubr.msk.f32.mxu1 %vm854_vm0, %v853_v0 }
  0x1d   :  { %726 = vmatmul.mubr.msk.f32.gmra.mxu0 %vm49_vm1, %v22_v19 }
  0x1e   :  { %728 = vmatprep.mubr.msk.f32.mxu0 %vm854_vm0, %v853_v0 }
  0x1f   :  { %747 = vmatmul.mubr.msk.f32.gmra.mxu1 %vm49_vm1, %v29_v20 }
  0x20   :  { %757 = vmatprep.mubr.msk.f32.mxu1 %vm854_vm0, %v853_v0 }
  0x21   :  { %729 = vmatmul.mubr.msk.f32.gmra.mxu0 %vm49_vm1, %v23_v21 }
  0x22   :  { %804 = vmatprep.mubr.msk.f32.mxu0 %vm854_vm0, %v853_v0 }
  0xc9   :  { %v155_v27 = vpop.f32.mrf.mxu0 }
  0xca   :  { %v156_v28 = vadd.f32 %v1017_v26, %v155_v27 }
  0xcb   :  { %v712_v29 = vpop.f32.mrf.mxu0  ;;  %v190_v30 = vpop.f32.mrf.mxu1 }
  0xcc   :  { %v219_v31 = vmax.f32 %v156_v28, 0.0  ;;  %v191_v2 = vadd.f32 %v1017_v26, %v190_v30 }
  0xcd   :  { %v160_v32 = vpop.f32.mrf.mxu0  ;;  %v733_v33 = vpop.f32.mrf.mxu1 }
  0xce   :  { %v161_v34 = vadd.f32 %v1017_v26, %v160_v32  ;;  %758 = vmatmul.mubr.msk.f32.vlgmr.msra.gmra.mxu1 %vm49_vm1, %v219_v31  ;;  %v226_v5 = vmax.f32 %v191_v2, 0.0 }
  0xcf   :  { %v715_v35 = vpop.f32.mrf.mxu0  ;;  %760 = vmatprep.mubr.msk.f32.mxu1 %vm854_vm0, %v853_v0  ;;  %v195_v36 = vpop.f32.mrf.mxu1 }
  0xd0   :  { %v220_v37 = vmax.f32 %v161_v34, 0.0  ;;  %v196_v6 = vadd.f32 %v1017_v26, %v195_v36 }
  0xd1   :  { %v165_v38 = vpop.f32.mrf.mxu0  ;;  %v736_v39 = vpop.f32.mrf.mxu1 }
  0xd2   :  { %v166_v40 = vadd.f32 %v1017_v26, %v165_v38  ;;  %761 = vmatmul.mubr.msk.f32.gmra.mxu1 %vm49_vm1, %v220_v37  ;;  %v227_v7 = vmax.f32 %v196_v6, 0.0  ;;  %v637_v6 = vld [vmem:[%s1182_s3 + $0x20] ss:$0 sm:$0xff] }
  0xd3   :  { %v718_v41 = vpop.f32.mrf.mxu0  ;;  %763 = vmatprep.mubr.msk.f32.mxu1 %vm854_vm0, %v853_v0  ;;  %v200_v42 = vpop.f32.mrf.mxu1 }
  0xd4   :  { %v221_v43 = vmax.f32 %v166_v40, 0.0  ;;  %v201_v8 = vadd.f32 %v1017_v26, %v200_v42 }
  0xd5   :  { %v170_v44 = vpop.f32.mrf.mxu0  ;;  %v739_v45 = vpop.f32.mrf.mxu1 }
  0xd6   :  { %v171_v46 = vadd.f32 %v1017_v26, %v170_v44  ;;  %764 = vmatmul.mubr.msk.f32.gmra.mxu1 %vm49_vm1, %v221_v43  ;;  %v228_v9 = vmax.f32 %v201_v8, 0.0 }
  0xd7   :  { %v721_v47 = vpop.f32.mrf.mxu0  ;;  %766 = vmatprep.mubr.msk.f32.mxu1 %vm854_vm0, %v853_v0  ;;  %v205_v48 = vpop.f32.mrf.mxu1 }
  0xd8   :  { %v222_v49 = vmax.f32 %v171_v46, 0.0  ;;  %v206_v10 = vadd.f32 %v1017_v26, %v205_v48 }
  0xd9   :  { %v175_v50 = vpop.f32.mrf.mxu0  ;;  %v742_v51 = vpop.f32.mrf.mxu1 }
  0xda   :  { %v176_v52 = vadd.f32 %v1017_v26, %v175_v50  ;;  %767 = vmatmul.mubr.msk.f32.gmra.mxu1 %vm49_vm1, %v222_v49  ;;  %v229_v11 = vmax.f32 %v206_v10, 0.0 }
  0xdb   :  { %v724_v53 = vpop.f32.mrf.mxu0  ;;  %769 = vmatprep.mubr.msk.f32.mxu1 %vm854_vm0, %v853_v0  ;;  %v210_v54 = vpop.f32.mrf.mxu1 }
  0xdc   :  { %v223_v55 = vmax.f32 %v176_v52, 0.0  ;;  %v211_v12 = vadd.f32 %v1017_v26, %v210_v54 }
  0xdd   :  { %v180_v56 = vpop.f32.mrf.mxu0  ;;  %v745_v57 = vpop.f32.mrf.mxu1 }
  0xde   :  { %v181_v58 = vadd.f32 %v1017_v26, %v180_v56  ;;  %770 = vmatmul.mubr.msk.f32.gmra.mxu1 %vm49_vm1, %v223_v55  ;;  %v230_v13 = vmax.f32 %v211_v12, 0.0 }
  0xdf   :  { %v727_v59 = vpop.f32.mrf.mxu0  ;;  %772 = vmatprep.mubr.msk.f32.mxu1 %vm854_vm0, %v853_v0  ;;  %v215_v60 = vpop.f32.mrf.mxu1 }
  0xe0   :  { %v224_v61 = vmax.f32 %v181_v58, 0.0  ;;  %v216_v14 = vadd.f32 %v1017_v26, %v215_v60 }
  0xe1   :  { %v185_v62 = vpop.f32.mrf.mxu0  ;;  %v748_v63 = vpop.f32.mrf.mxu1 }
  0xe2   :  { %v186_v1 = vadd.f32 %v1017_v26, %v185_v62  ;;  %773 = vmatmul.mubr.msk.f32.gmra.mxu1 %vm49_vm1, %v224_v61  ;;  %v231_v15 = vmax.f32 %v216_v14, 0.0 }
  0xe3   :  { %v730_v3 = vpop.f32.mrf.mxu0  ;;  %775 = vmatprep.mubr.msk.f32.mxu1 %vm854_vm0, %v853_v0 }
  0xe4   :  { %v225_v4 = vmax.f32 %v186_v1, 0.0 }
  0xe6   :  { %776 = vmatmul.mubr.msk.f32.gmra.mxu1 %vm49_vm1, %v225_v4 }
  0xe7   :  { %778 = vmatprep.mubr.msk.f32.mxu1 %vm854_vm0, %v853_v0 }
  0xea   :  { %779 = vmatmul.mubr.msk.f32.gmra.mxu1 %vm49_vm1, %v226_v5 }
  0xeb   :  { %781 = vmatprep.mubr.msk.f32.mxu1 %vm854_vm0, %v853_v0 }
  0xee   :  { %782 = vmatmul.mubr.msk.f32.gmra.mxu1 %vm49_vm1, %v227_v7 }
  0xef   :  { %784 = vmatprep.mubr.msk.f32.mxu1 %vm854_vm0, %v853_v0 }
  0xf2   :  { %785 = vmatmul.mubr.msk.f32.gmra.mxu1 %vm49_vm1, %v228_v9 }
  0xf3   :  { %787 = vmatprep.mubr.msk.f32.mxu1 %vm854_vm0, %v853_v0 }
  0xf6   :  { %788 = vmatmul.mubr.msk.f32.gmra.mxu1 %vm49_vm1, %v229_v11 }
  0xf7   :  { %790 = vmatprep.mubr.msk.f32.mxu1 %vm854_vm0, %v853_v0 }
  0xfa   :  { %791 = vmatmul.mubr.msk.f32.gmra.mxu1 %vm49_vm1, %v230_v13 }
  0xfb   :  { %793 = vmatprep.mubr.msk.f32.mxu1 %vm854_vm0, %v853_v0 }
  0xfe   :  { %794 = vmatmul.mubr.msk.f32.gmra.mxu1 %vm49_vm1, %v231_v15 }
 0x18e   :  { %v341_v17 = vpop.f32.mrf.mxu1 }
 0x18f   :  { %v342_v18 = vadd.f32 %v1072_v16, %v341_v17 }
 0x190   :  { %v759_v19 = vpop.f32.mrf.mxu1 }
 0x191   :  { %v405_v20 = vmax.f32 %v342_v18, 0.0 }
 0x192   :  { %v346_v21 = vpop.f32.mrf.mxu1 }
 0x193   :  { %v347_v22 = vadd.f32 %v1072_v16, %v346_v21  ;;  %805 = vmatmul.mubr.msk.f32.vlgmr.msra.gmra.mxu0 %vm49_vm1, %v405_v20 }
 0x194   :  { %v762_v23 = vpop.f32.mrf.mxu1  ;;  %807 = vmatprep.mubr.msk.f32.mxu0 %vm854_vm0, %v853_v0 }
 0x195   :  { %v406_v24 = vmax.f32 %v347_v22, 0.0 }
 0x196   :  { %v351_v25 = vpop.f32.mrf.mxu1 }
 0x197   :  { %v352_v26 = vadd.f32 %v1072_v16, %v351_v25  ;;  %808 = vmatmul.mubr.msk.f32.gmra.mxu0 %vm49_vm1, %v406_v24 }
 0x198   :  { %v765_v27 = vpop.f32.mrf.mxu1  ;;  %810 = vmatprep.mubr.msk.f32.mxu0 %vm854_vm0, %v853_v0 }
 0x199   :  { %v407_v28 = vmax.f32 %v352_v26, 0.0 }
 0x19a   :  { %v356_v29 = vpop.f32.mrf.mxu1 }
 0x19b   :  { %v357_v30 = vadd.f32 %v1072_v16, %v356_v29  ;;  %811 = vmatmul.mubr.msk.f32.gmra.mxu0 %vm49_vm1, %v407_v28 }
 0x19c   :  { %v768_v31 = vpop.f32.mrf.mxu1  ;;  %813 = vmatprep.mubr.msk.f32.mxu0 %vm854_vm0, %v853_v0 }
 0x19d   :  { %v408_v32 = vmax.f32 %v357_v30, 0.0 }
 0x19e   :  { %v361_v33 = vpop.f32.mrf.mxu1 }
 0x19f   :  { %v362_v34 = vadd.f32 %v1072_v16, %v361_v33  ;;  %814 = vmatmul.mubr.msk.f32.gmra.mxu0 %vm49_vm1, %v408_v32 }
 0x1a0   :  { %v771_v35 = vpop.f32.mrf.mxu1  ;;  %816 = vmatprep.mubr.msk.f32.mxu0 %vm854_vm0, %v853_v0 }
 0x1a1   :  { %v409_v36 = vmax.f32 %v362_v34, 0.0 }
 0x1a2   :  { %v366_v37 = vpop.f32.mrf.mxu1 }
 0x1a3   :  { %v367_v38 = vadd.f32 %v1072_v16, %v366_v37  ;;  %817 = vmatmul.mubr.msk.f32.gmra.mxu0 %vm49_vm1, %v409_v36 }
 0x1a4   :  { %v774_v39 = vpop.f32.mrf.mxu1  ;;  %819 = vmatprep.mubr.msk.f32.mxu0 %vm854_vm0, %v853_v0 }
 0x1a5   :  { %v410_v40 = vmax.f32 %v367_v38, 0.0 }
 0x1a6   :  { %v371_v41 = vpop.f32.mrf.mxu1 }
 0x1a7   :  { %v372_v42 = vadd.f32 %v1072_v16, %v371_v41  ;;  %820 = vmatmul.mubr.msk.f32.gmra.mxu0 %vm49_vm1, %v410_v40 }
 0x1a8   :  { %v777_v43 = vpop.f32.mrf.mxu1  ;;  %822 = vmatprep.mubr.msk.f32.mxu0 %vm854_vm0, %v853_v0 }
 0x1a9   :  { %v411_v44 = vmax.f32 %v372_v42, 0.0 }
 0x1aa   :  { %v376_v45 = vpop.f32.mrf.mxu1 }
 0x1ab   :  { %v377_v46 = vadd.f32 %v1072_v16, %v376_v45  ;;  %823 = vmatmul.mubr.msk.f32.gmra.mxu0 %vm49_vm1, %v411_v44 }
 0x1ac   :  { %v780_v47 = vpop.f32.mrf.mxu1  ;;  %825 = vmatprep.mubr.msk.f32.mxu0 %vm854_vm0, %v853_v0 }
 0x1ad   :  { %v412_v48 = vmax.f32 %v377_v46, 0.0 }
 0x1ae   :  { %v381_v49 = vpop.f32.mrf.mxu1 }
 0x1af   :  { %v382_v50 = vadd.f32 %v1072_v16, %v381_v49  ;;  %826 = vmatmul.mubr.msk.f32.gmra.mxu0 %vm49_vm1, %v412_v48 }
 0x1b0   :  { %v783_v51 = vpop.f32.mrf.mxu1  ;;  %828 = vmatprep.mubr.msk.f32.mxu0 %vm854_vm0, %v853_v0 }
 0x1b1   :  { %v413_v52 = vmax.f32 %v382_v50, 0.0 }
 0x1b2   :  { %v386_v53 = vpop.f32.mrf.mxu1 }
 0x1b3   :  { %v387_v54 = vadd.f32 %v1072_v16, %v386_v53  ;;  %829 = vmatmul.mubr.msk.f32.gmra.mxu0 %vm49_vm1, %v413_v52 }
 0x1b4   :  { %v786_v55 = vpop.f32.mrf.mxu1  ;;  %831 = vmatprep.mubr.msk.f32.mxu0 %vm854_vm0, %v853_v0 }
 0x1b5   :  { %v414_v56 = vmax.f32 %v387_v54, 0.0 }
 0x1b6   :  { %v391_v57 = vpop.f32.mrf.mxu1 }
 0x1b7   :  { %v392_v58 = vadd.f32 %v1072_v16, %v391_v57  ;;  %832 = vmatmul.mubr.msk.f32.gmra.mxu0 %vm49_vm1, %v414_v56 }
 0x1b8   :  { %v789_v59 = vpop.f32.mrf.mxu1  ;;  %834 = vmatprep.mubr.msk.f32.mxu0 %vm854_vm0, %v853_v0 }
 0x1b9   :  { %v415_v60 = vmax.f32 %v392_v58, 0.0 }
 0x1ba   :  { %v396_v61 = vpop.f32.mrf.mxu1 }
 0x1bb   :  { %v397_v62 = vadd.f32 %v1072_v16, %v396_v61  ;;  %835 = vmatmul.mubr.msk.f32.gmra.mxu0 %vm49_vm1, %v415_v60 }
 0x1bc   :  { %v792_v63 = vpop.f32.mrf.mxu1  ;;  %837 = vmatprep.mubr.msk.f32.mxu0 %vm854_vm0, %v853_v0 }
 0x1bd   :  { %v416_v1 = vmax.f32 %v397_v62, 0.0 }
 0x1be   :  { %v401_v2 = vpop.f32.mrf.mxu1 }
 0x1bf   :  { %v402_v3 = vadd.f32 %v1072_v16, %v401_v2  ;;  %838 = vmatmul.mubr.msk.f32.gmra.mxu0 %vm49_vm1, %v416_v1 }
 0x1c0   :  { %v795_v4 = vpop.f32.mrf.mxu1  ;;  %840 = vmatprep.mubr.msk.f32.mxu0 %vm854_vm0, %v853_v0 }
 0x1c1   :  { %v417_v5 = vmax.f32 %v402_v3, 0.0 }
 0x1c3   :  { %841 = vmatmul.mubr.msk.f32.gmra.mxu0 %vm49_vm1, %v417_v5 }
 0x253   :  { %v527_v7 = vpop.f32.mrf.mxu0 }
 0x254   :  { %v528_v8 = vadd.f32 %v637_v6, %v527_v7 }
 0x255   :  { %v806_v9 = vpop.f32.mrf.mxu0 }
 0x256   :  { %592 = vst.msk [vmem:[%s1183_s4] sm:$0xff] %vm591_vm2, %v528_v8 }
 0x257   :  { %v532_v10 = vpop.f32.mrf.mxu0 }
 0x258   :  { %v533_v11 = vadd.f32 %v637_v6, %v532_v10 }
 0x259   :  { %v809_v12 = vpop.f32.mrf.mxu0 }
 0x25a   :  { %593 = vst.msk [vmem:[%s1183_s4 + $0x8] sm:$0xff] %vm591_vm2, %v533_v11 }
 0x25b   :  { %v537_v0 = vpop.f32.mrf.mxu0 }
 0x25c   :  { %v538_v13 = vadd.f32 %v637_v6, %v537_v0 }
 0x25d   :  { %v812_v14 = vpop.f32.mrf.mxu0 }
 0x25e   :  { %594 = vst.msk [vmem:[%s1183_s4 + $0x10] sm:$0xff] %vm591_vm2, %v538_v13 }
 0x25f   :  { %v542_v15 = vpop.f32.mrf.mxu0 }
 0x260   :  { %v543_v16 = vadd.f32 %v637_v6, %v542_v15 }
 0x261   :  { %v815_v17 = vpop.f32.mrf.mxu0 }
 0x262   :  { %595 = vst.msk [vmem:[%s1183_s4 + $0x18] sm:$0xff] %vm591_vm2, %v543_v16 }
 0x263   :  { %v547_v18 = vpop.f32.mrf.mxu0 }
 0x264   :  { %v548_v19 = vadd.f32 %v637_v6, %v547_v18 }
 0x265   :  { %v818_v20 = vpop.f32.mrf.mxu0 }
 0x266   :  { %596 = vst.msk [vmem:[%s1183_s4 + $0x20] sm:$0xff] %vm591_vm2, %v548_v19 }
 0x267   :  { %v552_v21 = vpop.f32.mrf.mxu0 }
 0x268   :  { %v553_v22 = vadd.f32 %v637_v6, %v552_v21 }
 0x269   :  { %v821_v23 = vpop.f32.mrf.mxu0 }
 0x26a   :  { %597 = vst.msk [vmem:[%s1183_s4 + $0x28] sm:$0xff] %vm591_vm2, %v553_v22 }
 0x26b   :  { %v557_v24 = vpop.f32.mrf.mxu0 }
 0x26c   :  { %v558_v25 = vadd.f32 %v637_v6, %v557_v24 }
 0x26d   :  { %v824_v26 = vpop.f32.mrf.mxu0 }
 0x26e   :  { %598 = vst.msk [vmem:[%s1183_s4 + $0x30] sm:$0xff] %vm591_vm2, %v558_v25 }
 0x26f   :  { %v562_v27 = vpop.f32.mrf.mxu0 }
 0x270   :  { %v563_v28 = vadd.f32 %v637_v6, %v562_v27 }
 0x271   :  { %v827_v29 = vpop.f32.mrf.mxu0 }
 0x272   :  { %599 = vst.msk [vmem:[%s1183_s4 + $0x38] sm:$0xff] %vm591_vm2, %v563_v28 }
 0x273   :  { %v567_v30 = vpop.f32.mrf.mxu0 }
 0x274   :  { %v568_v31 = vadd.f32 %v637_v6, %v567_v30 }
 0x275   :  { %v830_v32 = vpop.f32.mrf.mxu0 }
 0x276   :  { %600 = vst.msk [vmem:[%s1183_s4 + $0x40] sm:$0xff] %vm591_vm2, %v568_v31 }
 0x277   :  { %v572_v33 = vpop.f32.mrf.mxu0 }
 0x278   :  { %v573_v34 = vadd.f32 %v637_v6, %v572_v33 }
 0x279   :  { %v833_v35 = vpop.f32.mrf.mxu0 }
 0x27a   :  { %601 = vst.msk [vmem:[%s1183_s4 + $0x48] sm:$0xff] %vm591_vm2, %v573_v34 }
 0x27b   :  { %v577_v36 = vpop.f32.mrf.mxu0 }
 0x27c   :  { %v578_v37 = vadd.f32 %v637_v6, %v577_v36 }
 0x27d   :  { %v836_v38 = vpop.f32.mrf.mxu0 }
 0x27e   :  { %602 = vst.msk [vmem:[%s1183_s4 + $0x50] sm:$0xff] %vm591_vm2, %v578_v37 }
 0x27f   :  { %v582_v39 = vpop.f32.mrf.mxu0 }
 0x280   :  { %v583_v40 = vadd.f32 %v637_v6, %v582_v39 }
 0x281   :  { %v839_v41 = vpop.f32.mrf.mxu0 }
 0x282   :  { %603 = vst.msk [vmem:[%s1183_s4 + $0x58] sm:$0xff] %vm591_vm2, %v583_v40 }
 0x283   :  { %v587_v42 = vpop.f32.mrf.mxu0 }
 0x284   :  { %v588_v43 = vadd.f32 %v637_v6, %v587_v42 }
 0x285   :  { %v842_v44 = vpop.f32.mrf.mxu0 }
 0x286   :  { %604 = vst.msk [vmem:[%s1183_s4 + $0x60] sm:$0xff] %vm591_vm2, %v588_v43 }

</bundles_post_ra>
